<compile_context>
chip_gen: v6e
topology: v6e:2x2x1
jax: 0.10.0
libtpu: 0.0.40
codegen_flags: <defaults>
</compile_context>

<pallas_src>
import jax
import jax.numpy as jnp
from jax.experimental import pallas as pl
from jax.experimental.pallas import tpu as pltpu

IN_F = 784         # flattened MNIST image
H1P = 128          # 100 -> padded to 128 lanes
H2P = 128          # 50  -> padded to 128 lanes
OUTP = 128         # 10  -> padded to 128 lanes
OUT_F = 10
DEFAULT_TB = 2048  # batch tile (sweep 1024/2048/4096); HBM-bound -> bigger is better
VMEM_LIMIT_BYTES = 32 * 1024 * 1024  # covers TB=2048 f32 x tiles on v5e/v6e/v7x


def _round_up(n, m):
    return ((n + m - 1) // m) * m


def mlp_kernel(x_ref, w1_ref, b1_ref, w2_ref, b2_ref, w3_ref, b3_ref, o_ref):
    # x arrives f32 straight from HBM (no wrapper pad/cast pass); bf16 cast on the
    # VPU is free here (VALU slot has huge slack in this memory-bound kernel).
    x = x_ref[...].astype(jnp.bfloat16)
    # fc1 + ReLU   (bf16 MXU inputs, f32 accumulate, bias add in f32)
    h1 = jnp.dot(x, w1_ref[...], preferred_element_type=jnp.float32)
    h1 = jnp.maximum(h1 + b1_ref[...], 0.0).astype(w2_ref.dtype)
    # fc2 + ReLU
    h2 = jnp.dot(h1, w2_ref[...], preferred_element_type=jnp.float32)
    h2 = jnp.maximum(h2 + b2_ref[...], 0.0).astype(w3_ref.dtype)
    # out (no activation) -- lane-dense (TB, 128) bf16 store, sliced to 10 outside
    o_ref[...] = (
        jnp.dot(h2, w3_ref[...], preferred_element_type=jnp.float32) + b3_ref[...]
    ).astype(o_ref.dtype)


def _pad_to(a, rows, cols, dtype):
    """Zero-pad a 2-D array to (rows, cols) and cast (tiny weight/bias arrays only)."""
    return jnp.pad(a, ((0, rows - a.shape[0]), (0, cols - a.shape[1]))).astype(dtype)


def _choose_tb(batch, tb_req):
    """Pick batch tile: multiple of 16, no batch padding needed, and prefer an even
    number of grid steps so both v7x TensorCores receive work under 'parallel'."""
    tb = max(16, _round_up(min(tb_req, batch), 16))
    if batch <= tb:
        # Whole batch fits one tile (block == full array dim, so no (8,128) issue).
        # For large batches still split in two so v7x's second TC isn't idle.
        half = _round_up(pl.cdiv(batch, 2), 16)
        if batch >= 1024 and half < batch:
            return half
        return batch
    steps = pl.cdiv(batch, tb)
    if steps > 1 and steps % 2 == 1:
        alt = _round_up(pl.cdiv(batch, steps + 1), 16)
        if alt >= 16 and pl.cdiv(batch, alt) % 2 == 0:
            tb = alt
    return tb


def mnist_mlp_forward(x, params, *, tb=DEFAULT_TB):
    """x: any shape that flattens to (-1, 784), e.g. (B, 1, 28, 28) NCHW."""
    w1, b1, w2, b2, w3, b3 = params
    x2d = x.reshape(-1, IN_F).astype(jnp.float32)
    B = x2d.shape[0]

    # --- prepare small operands (weights/biases) once per call ---------------
    w1p = _pad_to(w1, IN_F, H1P, jnp.bfloat16)   # (784, 128)
    w2p = _pad_to(w2, H1P, H2P, jnp.bfloat16)    # (128, 128)
    w3p = _pad_to(w3, H2P, OUTP, jnp.bfloat16)   # (128, 128)
    b1p = _pad_to(b1.reshape(1, -1), 1, H1P, jnp.float32)
    b2p = _pad_to(b2.reshape(1, -1), 1, H2P, jnp.float32)
    b3p = _pad_to(b3.reshape(1, -1), 1, OUTP, jnp.float32)

    tbe = _choose_tb(B, tb)
    grid = (pl.cdiv(B, tbe),)   # ragged last block is masked by Pallas; no x pad copy

    const = lambda shape: pl.BlockSpec(shape, lambda i: (0, 0))

    cost = pl.CostEstimate(
        flops=2 * B * (IN_F * H1P + H1P * H2P + H2P * OUTP),
        transcendentals=0,
        bytes_accessed=int(
            B * IN_F * 4                                    # x read (f32)
            + B * OUTP * 2                                  # logits write (bf16)
            + (IN_F * H1P + H1P * H2P + H2P * OUTP) * 2     # bf16 weights
            + (H1P + H2P + OUTP) * 4                        # f32 biases
        ),
    )

    out = pl.pallas_call(
        mlp_kernel,
        out_shape=jax.ShapeDtypeStruct((B, OUTP), jnp.bfloat16),
        grid=grid,
        in_specs=[
            pl.BlockSpec((tbe, IN_F), lambda i: (i, 0)),    # x tile, streamed (f32)
            const((IN_F, H1P)),                             # w1 (VMEM-resident)
            const((1, H1P)),                                # b1
            const((H1P, H2P)),                              # w2
            const((1, H2P)),                                # b2
            const((H2P, OUTP)),                             # w3
            const((1, OUTP)),                               # b3
        ],
        out_specs=pl.BlockSpec((tbe, OUTP), lambda i: (i, 0)),
        compiler_params=pltpu.CompilerParams(
            dimension_semantics=("parallel",),
            vmem_limit_bytes=VMEM_LIMIT_BYTES,
        ),
        cost_estimate=cost,
    )(x2d, w1p, b1p, w2p, b2p, w3p, b3p)

    # Drop the 10->128 lane padding; return f32 logits like the nn.Module.
    return out[:, :OUT_F].astype(jnp.float32)


def init_params(key):
    """Deterministic init mimicking nn.Linear's uniform(-1/sqrt(fan_in), 1/sqrt(fan_in)).
    Weights stored as (in_features, out_features); biases as (out_features,)."""
    def linear(k, fan_in, fan_out):
        kw, kb = jax.random.split(k)
        bound = 1.0 / jnp.sqrt(fan_in)
        w = jax.random.uniform(kw, (fan_in, fan_out), jnp.float32, -bound, bound)
        b = jax.random.uniform(kb, (fan_out,), jnp.float32, -bound, bound)
        return w, b

    k1, k2, k3 = jax.random.split(key, 3)
    w1, b1 = linear(k1, 784, 100)
    w2, b2 = linear(k2, 100, 50)
    w3, b3 = linear(k3, 50, 10)
    return (w1, b1, w2, b2, w3, b3)


def reference_forward(x, params):
    """Pure-JAX reference with matching bf16-input / f32-accumulate numerics."""
    w1, b1, w2, b2, w3, b3 = params
    f32 = jnp.float32
    bf = lambda a: a.astype(jnp.bfloat16).astype(f32)
    x2d = bf(x.reshape(-1, IN_F))
    h1 = jnp.maximum(x2d @ bf(w1) + b1, 0.0)
    h2 = jnp.maximum(bf(h1) @ bf(w2) + b2, 0.0)
    return bf(h2) @ bf(w3) + b3


if __name__ == "__main__":
    key = jax.random.PRNGKey(0)
    kx, kp, kx2 = jax.random.split(key, 3)
    params = init_params(kp)

    # Small MNIST-like batch, NCHW as PyTorch would pass it (single full-array block).
    x = jax.random.normal(kx, (2, 1, 28, 28), dtype=jnp.float32)
    out = jax.block_until_ready(mnist_mlp_forward(x, params))
    ref = reference_forward(x, params)
    assert out.shape == (2, 10), out.shape
    assert jnp.allclose(out, ref, atol=2e-2, rtol=2e-2), "mismatch vs reference (B=2)"

    # Exercise the multi-step grid + ragged (masked) last block with a tiny tile.
    x_big = jax.random.normal(kx2, (50, 1, 28, 28), dtype=jnp.float32)
    out_big = jax.block_until_ready(mnist_mlp_forward(x_big, params, tb=16))
    ref_big = reference_forward(x_big, params)
    assert out_big.shape == (50, 10), out_big.shape
    assert jnp.allclose(out_big, ref_big, atol=2e-2, rtol=2e-2), "mismatch vs reference (B=50)"

    print("KERNEL_OK")
</pallas_src>

<mosaic_0001>
module attributes {stable_mosaic.version = 11 : i64} {
  func.func @mlp_kernel(%arg0: i32, %arg1: memref<2x784xf32, #tpu.memory_space<vmem>>, %arg2: memref<784x128xbf16, #tpu.memory_space<vmem>>, %arg3: memref<1x128xf32, #tpu.memory_space<vmem>>, %arg4: memref<128x128xbf16, #tpu.memory_space<vmem>>, %arg5: memref<1x128xf32, #tpu.memory_space<vmem>>, %arg6: memref<128x128xbf16, #tpu.memory_space<vmem>>, %arg7: memref<1x128xf32, #tpu.memory_space<vmem>>, %arg8: memref<2x128xbf16, #tpu.memory_space<vmem>>) attributes {dimension_semantics = [#tpu.dimension_semantics<parallel>], iteration_bounds = array<i64: 1>, scalar_prefetch = 0 : i64, scratch_operands = 0 : i64, tpu.core_type = #tpu.core_type<tc>, window_params = [{transform_indices = @transform_0, window_bounds = array<i64: 2, 784>}, {pipeline_mode = #tpu.pipeline_mode<synchronous>, transform_indices = @transform_1, window_bounds = array<i64: 784, 128>}, {pipeline_mode = #tpu.pipeline_mode<synchronous>, transform_indices = @transform_2, window_bounds = array<i64: 1, 128>}, {pipeline_mode = #tpu.pipeline_mode<synchronous>, transform_indices = @transform_3, window_bounds = array<i64: 128, 128>}, {pipeline_mode = #tpu.pipeline_mode<synchronous>, transform_indices = @transform_4, window_bounds = array<i64: 1, 128>}, {pipeline_mode = #tpu.pipeline_mode<synchronous>, transform_indices = @transform_5, window_bounds = array<i64: 128, 128>}, {pipeline_mode = #tpu.pipeline_mode<synchronous>, transform_indices = @transform_6, window_bounds = array<i64: 1, 128>}, {transform_indices = @transform_7, window_bounds = array<i64: 2, 128>}]} {
    %c0 = arith.constant 0 : index
    %c0_0 = arith.constant 0 : index
    %0 = vector.load %arg1[%c0, %c0_0] : memref<2x784xf32, #tpu.memory_space<vmem>>, vector<2x784xf32>
    %1 = arith.truncf %0 : vector<2x784xf32> to vector<2x784xbf16>
    %c0_1 = arith.constant 0 : index
    %c0_2 = arith.constant 0 : index
    %2 = vector.load %arg2[%c0_1, %c0_2] : memref<784x128xbf16, #tpu.memory_space<vmem>>, vector<784x128xbf16>
    %cst = arith.constant dense<0.000000e+00> : vector<2x128xf32>
    %3 = tpu.matmul %1, %2, %cst {dimension_numbers = #tpu.dot_dimension_numbers<[1], [0], [0], [1], [0, 0, 1, 1], [], []>} : vector<2x784xbf16>, vector<784x128xbf16>, vector<2x128xf32> -> vector<2x128xf32>
    %c0_3 = arith.constant 0 : index
    %c0_4 = arith.constant 0 : index
    %4 = vector.load %arg3[%c0_3, %c0_4] : memref<1x128xf32, #tpu.memory_space<vmem>>, vector<1x128xf32>
    %5 = vector.broadcast %4 : vector<1x128xf32> to vector<2x128xf32>
    %6 = arith.addf %3, %5 : vector<2x128xf32>
    %cst_5 = arith.constant 0.000000e+00 : f32
    %7 = vector.broadcast %cst_5 : f32 to vector<2x128xf32>
    %8 = arith.maximumf %6, %7 : vector<2x128xf32>
    %9 = arith.truncf %8 : vector<2x128xf32> to vector<2x128xbf16>
    %c0_6 = arith.constant 0 : index
    %c0_7 = arith.constant 0 : index
    %10 = vector.load %arg4[%c0_6, %c0_7] : memref<128x128xbf16, #tpu.memory_space<vmem>>, vector<128x128xbf16>
    %cst_8 = arith.constant dense<0.000000e+00> : vector<2x128xf32>
    %11 = tpu.matmul %9, %10, %cst_8 {dimension_numbers = #tpu.dot_dimension_numbers<[1], [0], [0], [1], [0, 0, 1, 1], [], []>} : vector<2x128xbf16>, vector<128x128xbf16>, vector<2x128xf32> -> vector<2x128xf32>
    %c0_9 = arith.constant 0 : index
    %c0_10 = arith.constant 0 : index
    %12 = vector.load %arg5[%c0_9, %c0_10] : memref<1x128xf32, #tpu.memory_space<vmem>>, vector<1x128xf32>
    %13 = vector.broadcast %12 : vector<1x128xf32> to vector<2x128xf32>
    %14 = arith.addf %11, %13 : vector<2x128xf32>
    %cst_11 = arith.constant 0.000000e+00 : f32
    %15 = vector.broadcast %cst_11 : f32 to vector<2x128xf32>
    %16 = arith.maximumf %14, %15 : vector<2x128xf32>
    %17 = arith.truncf %16 : vector<2x128xf32> to vector<2x128xbf16>
    %c0_12 = arith.constant 0 : index
    %c0_13 = arith.constant 0 : index
    %18 = vector.load %arg6[%c0_12, %c0_13] : memref<128x128xbf16, #tpu.memory_space<vmem>>, vector<128x128xbf16>
    %cst_14 = arith.constant dense<0.000000e+00> : vector<2x128xf32>
    %19 = tpu.matmul %17, %18, %cst_14 {dimension_numbers = #tpu.dot_dimension_numbers<[1], [0], [0], [1], [0, 0, 1, 1], [], []>} : vector<2x128xbf16>, vector<128x128xbf16>, vector<2x128xf32> -> vector<2x128xf32>
    %c0_15 = arith.constant 0 : index
    %c0_16 = arith.constant 0 : index
    %20 = vector.load %arg7[%c0_15, %c0_16] : memref<1x128xf32, #tpu.memory_space<vmem>>, vector<1x128xf32>
    %21 = vector.broadcast %20 : vector<1x128xf32> to vector<2x128xf32>
    %22 = arith.addf %19, %21 : vector<2x128xf32>
    %23 = arith.truncf %22 : vector<2x128xf32> to vector<2x128xbf16>
    %c0_17 = arith.constant 0 : index
    %c0_18 = arith.constant 0 : index
    %24 = vector.load %arg8[%c0_17, %c0_18] : memref<2x128xbf16, #tpu.memory_space<vmem>>, vector<2x128xbf16>
    tpu.vector_store %arg8[%c0_17, %c0_18], %23 {strides = array<i32>} : memref<2x128xbf16, #tpu.memory_space<vmem>>, vector<2x128xbf16>,
    return
  }
  func.func @transform_0(%arg0: i32) -> (i32, i32) {
    %c0_i32 = arith.constant 0 : i32
    %c0_i32_0 = arith.constant 0 : i32
    return %arg0, %c0_i32 : i32, i32
  }
  func.func @transform_1(%arg0: i32) -> (i32, i32) {
    %c0_i32 = arith.constant 0 : i32
    %c0_i32_0 = arith.constant 0 : i32
    %c0_i32_1 = arith.constant 0 : i32
    return %c0_i32, %c0_i32_0 : i32, i32
  }
  func.func @transform_2(%arg0: i32) -> (i32, i32) {
    %c0_i32 = arith.constant 0 : i32
    %c0_i32_0 = arith.constant 0 : i32
    %c0_i32_1 = arith.constant 0 : i32
    return %c0_i32, %c0_i32_0 : i32, i32
  }
  func.func @transform_3(%arg0: i32) -> (i32, i32) {
    %c0_i32 = arith.constant 0 : i32
    %c0_i32_0 = arith.constant 0 : i32
    %c0_i32_1 = arith.constant 0 : i32
    return %c0_i32, %c0_i32_0 : i32, i32
  }
  func.func @transform_4(%arg0: i32) -> (i32, i32) {
    %c0_i32 = arith.constant 0 : i32
    %c0_i32_0 = arith.constant 0 : i32
    %c0_i32_1 = arith.constant 0 : i32
    return %c0_i32, %c0_i32_0 : i32, i32
  }
  func.func @transform_5(%arg0: i32) -> (i32, i32) {
    %c0_i32 = arith.constant 0 : i32
    %c0_i32_0 = arith.constant 0 : i32
    %c0_i32_1 = arith.constant 0 : i32
    return %c0_i32, %c0_i32_0 : i32, i32
  }
  func.func @transform_6(%arg0: i32) -> (i32, i32) {
    %c0_i32 = arith.constant 0 : i32
    %c0_i32_0 = arith.constant 0 : i32
    %c0_i32_1 = arith.constant 0 : i32
    return %c0_i32, %c0_i32_0 : i32, i32
  }
  func.func @transform_7(%arg0: i32) -> (i32, i32) {
    %c0_i32 = arith.constant 0 : i32
    %c0_i32_0 = arith.constant 0 : i32
    return %arg0, %c0_i32 : i32, i32
  }
}

</mosaic_0001>

<bundles_post_ra>
// kernel: tpu_custom_call.1
= control target key start
LH: loop header
LB: loop body
LE: loop exit
PB: predicated region body
PF: predicated region fallthrough
CT: control target
= control target key end

     0   :  { %12 = vsyncpa [#allocation3], 0  ;;  %s1433_s0 = inlined_call_operand.hbm [shape: f32[2,784], index: 0, kind: input, shape index: {}]   ;;  %s1434_s1 = inlined_call_operand.hbm [shape: bf16[784,128], index: 1, kind: input, shape index: {}]   ;;  %s1435_s2 = inlined_call_operand.vmem [shape: f32[1,128], index: 2, kind: input, shape index: {}]   ;;  %s1436_s3 = inlined_call_operand.hbm [shape: bf16[128,128], index: 3, kind: input, shape index: {}]   ;;  %s1437_s4 = inlined_call_operand.vmem [shape: f32[1,128], index: 4, kind: input, shape index: {}]   ;;  %s1438_s5 = inlined_call_operand.hbm [shape: bf16[128,128], index: 5, kind: input, shape index: {}]   ;;  %s1439_s6 = inlined_call_operand.vmem [shape: f32[1,128], index: 6, kind: input, shape index: {}]   ;;  %s1440_s7 = inlined_call_operand.hbm [shape: bf16[2,128], index: 7, kind: output, shape index: {}]  }
   0x1   :  { %13 = vsyncpa [#allocation6], 0 }
   0x2   :  { %14 = vsyncpa [#allocation9], 0 }
   0x3   :  { %15 = vsyncpa [#allocation4], 0  ;;  %s1326_s24 = smov [#allocation5]  }
   0x4   :  { %s31_s25 = sshll.u32 %s1326_s24, 4  ;;  %s32_s25 = int_to_ptr.vmem [resolvable:$true] %s31_s25 }
   0x5   :  { %s1226_s26 = scalar_lea.vmem %s32_s25, 6272  ;;  %p1231_p1 = scmp.lt.s32.totalorder %s32_s25, %s32_s25 }
   0x6   :  { %p1227_p0 = scmp.ne.s32.totalorder %s32_s25, %s1226_s26  ;;  %p1232_p2 = scmp.lt.s32.totalorder %s1226_s26, %s1226_s26 }
   0x8   :  { %p1233_p3 = por %p1232_p2, %p1231_p1 }
   0xa   :  { %p1234_p4 = pnand %p1233_p3, %p1227_p0 }
   0xc   :  { %1237 = shalt.err (!%p1234_p4)
}
   0xd   :  { %s1327_s27 = smov 64   ;;  %s1328_s28 = smov 4  }
   0xe   :  { %37 = dma.hbm_to_vmem [thread:$0]  %s1434_s1, 6272, %s32_s25, [#allocation6], %s1327_s27, %s1327_s27, %s1328_s28  }
   0xf   :  { %s1329_s8 = smov [#allocation2]   ;;  %s1330_s10 = smov [#allocation7]  }
  0x10   :  { %s22_s9 = sshll.u32 %s1329_s8, 4  ;;  %s45_s11 = sshll.u32 %s1330_s10, 4  ;;  %s23_s9 = int_to_ptr.vmem [resolvable:$true] %s22_s9  ;;  %s46_s11 = int_to_ptr.vmem [resolvable:$true] %s45_s11 }
  0x11   :  { %s1246_s12 = scalar_lea.vmem %s23_s9, 224  ;;  %p1251_p6 = scmp.lt.s32.totalorder %s23_s9, %s23_s9 }
  0x12   :  { %p1247_p5 = scmp.ne.s32.totalorder %s23_s9, %s1246_s12  ;;  %p1252_p7 = scmp.lt.s32.totalorder %s1246_s12, %s1246_s12 }
  0x14   :  { %p1253_p8 = por %p1252_p7, %p1251_p6 }
  0x16   :  { %p1254_p9 = pnand %p1253_p8, %p1247_p5 }
  0x18   :  { %1257 = shalt.err (!%p1254_p9)
}
  0x19   :  { %25 = dma.hbm_to_vmem [thread:$0]  %s1433_s0, 224, %s23_s9, [#allocation3]  }
  0x1a   :  { %s1266_s15 = scalar_lea.vmem %s46_s11, 1024  ;;  %p1271_p11 = scmp.lt.s32.totalorder %s46_s11, %s46_s11 }
  0x1b   :  { %p1267_p10 = scmp.ne.s32.totalorder %s46_s11, %s1266_s15  ;;  %p1272_p12 = scmp.lt.s32.totalorder %s1266_s15, %s1266_s15 }
  0x1d   :  { %p1273_p13 = por %p1272_p12, %p1271_p11 }
  0x1f   :  { %p1274_p0 = pnand %p1273_p13, %p1267_p10 }
  0x21   :  { %1277 = shalt.err (!%p1274_p0)
}
  0x22   :  { %51 = dma.hbm_to_vmem [thread:$0]  %s1436_s3, 1024, %s46_s11, [#allocation6], %s1327_s27, %s1327_s27, %s1328_s28  }
  0x23   :  { %s1331_s17 = smov [#allocation8]  }
  0x24   :  { %s59_s18 = sshll.u32 %s1331_s17, 4  ;;  %s60_s18 = int_to_ptr.vmem [resolvable:$true] %s59_s18 }
  0x25   :  { %s1286_s19 = scalar_lea.vmem %s60_s18, 1024  ;;  %p1291_p2 = scmp.lt.s32.totalorder %s60_s18, %s60_s18 }
  0x26   :  { %p1287_p1 = scmp.ne.s32.totalorder %s60_s18, %s1286_s19  ;;  %p1292_p3 = scmp.lt.s32.totalorder %s1286_s19, %s1286_s19 }
  0x28   :  { %p1293_p4 = por %p1292_p3, %p1291_p2 }
  0x2a   :  { %p1294_p5 = pnand %p1293_p4, %p1287_p1 }
  0x2c   :  { %1297 = shalt.err (!%p1294_p5)
}
  0x2d   :  { %65 = dma.hbm_to_vmem [thread:$0]  %s1438_s5, 1024, %s60_s18, [#allocation9], %s1327_s27, %s1327_s27, %s1328_s28  }
  0x2e   :  { %1318 = dma.done.wait [#allocation3], 224  }
  0x2f   :  { %1319 = vsyncadd [#allocation3], 4294967072 }
  0x30   :  { %1320 = dma.done.wait [#allocation6], 7296  }
  0x31   :  { %1321 = vsyncadd [#allocation6], 4294960000 }
  0x32   :  { %1322 = dma.done.wait [#allocation9], 1024  }
  0x33   :  { %1323 = vsyncadd [#allocation9], 4294966272  ;;  %v1151_v0 = vld [vmem:[#allocation5 + $0x78] sm:$0xff]   ;;  %v1155_v4 = vld [vmem:[#allocation5 + $0x70] sm:$0xff]   ;;  %v1332_v21 = vmov 1983009808   ;;  %v89_v23 = vlaneseq }
  0x34   :  { %v1152_v1 = vld [vmem:[#allocation5 + $0x38] sm:$0xff]   ;;  %1009 = vmatprep.subr.bf16.mxu0 %v1151_v0  ;;  %v1156_v5 = vld [vmem:[#allocation5 + $0x30] sm:$0xff]   ;;  %v1159_v8 = vld [vmem:[#allocation5 + $0x68] sm:$0xff]   ;;  %v87_v22 = vunpack.c.l.s4 %v1332_v21  ;;  %v1333_v45 = vmov 0.0   ;;  %vm1334_vm0 = vmmov 0   ;;  %vm531_vm1 = vcmask 130048  }
  0x35   :  { %v1153_v2 = vld [vmem:[#allocation5 + $0xf8] sm:$0xff]   ;;  %1010 = vmatpush3.bf16.msra.mxu0 %v1152_v1  ;;  %v1157_v6 = vld [vmem:[#allocation5 + $0xf0] sm:$0xff]   ;;  %v1160_v9 = vld [vmem:[#allocation5 + $0x28] sm:$0xff]   ;;  %v90_v29 = vshrl.u32 %v89_v23, 7  ;;  %s1335_s24 = smov [#allocation10]  }
  0x36   :  { %v1154_v3 = vld [vmem:[#allocation5 + $0xb8] sm:$0xff]   ;;  %1031 = vmatprep.subr.bf16.mxu1 %v1153_v2  ;;  %1011 = vmatprep.subr.bf16.mxu0 %v1155_v4  ;;  %v1158_v7 = vld [vmem:[#allocation5 + $0xb0] sm:$0xff]   ;;  %v1161_v10 = vld [vmem:[#allocation5 + $0xe8] sm:$0xff]   ;;  %v88_v28 = vunpack.c.0.s8 %v87_v22  ;;  %s929_s25 = sshll.u32 %s1335_s24, 4  ;;  %s930_s25 = int_to_ptr.vmem [resolvable:$true] %s929_s25 }
  0x37   :  { %1032 = vmatpush3.bf16.msra.mxu1 %v1154_v3  ;;  %v1162_v11 = vld [vmem:[#allocation5 + $0xa8] sm:$0xff]   ;;  %v1163_v12 = vld [vmem:[#allocation5 + $0x60] sm:$0xff]   ;;  %v1167_v16 = vld [vmem:[#allocation5 + $0x58] sm:$0xff]   ;;  %s1302_s26 = scalar_lea.vmem %s930_s25, 32  ;;  %p1303_p7 = scmp.lt.s32.totalorder %s930_s25, %s930_s25 }
  0x38   :  { %1033 = vmatprep.subr.bf16.mxu1 %v1157_v6  ;;  %v1164_v13 = vld [vmem:[#allocation5 + $0x20] sm:$0xff]   ;;  %v1168_v17 = vld [vmem:[#allocation5 + $0x18] sm:$0xff]   ;;  %v1171_v20 = vld [vmem:[#allocation5 + $0x50] sm:$0xff]   ;;  %v91_v34 = vsub.s32 %v88_v28, %v90_v29 }
  0x39   :  { %1012 = vmatpush3.bf16.msra.mxu0 %v1156_v5  ;;  %v1165_v14 = vld [vmem:[#allocation5 + $0xe0] sm:$0xff]   ;;  %v1169_v18 = vld [vmem:[#allocation5 + $0xd8] sm:$0xff]   ;;  %v1172_v24 = vld [vmem:[#allocation5 + $0x10] sm:$0xff]  }
  0x3a   :  { %1013 = vmatprep.subr.bf16.mxu0 %v1159_v8  ;;  %v1166_v15 = vld [vmem:[#allocation5 + $0xa0] sm:$0xff]   ;;  %v1170_v19 = vld [vmem:[#allocation5 + $0x98] sm:$0xff]   ;;  %v1173_v25 = vld [vmem:[#allocation5 + $0xd0] sm:$0xff]  }
  0x3b   :  { %1034 = vmatpush3.bf16.msra.mxu1 %v1158_v7  ;;  %v1174_v26 = vld [vmem:[#allocation5 + $0x90] sm:$0xff]   ;;  %v1175_v27 = vld [vmem:[#allocation5 + $0x48] sm:$0xff]   ;;  %v1179_v33 = vld [vmem:[#allocation5 + $0x40] sm:$0xff]  }
  0x3c   :  { %1035 = vmatprep.subr.bf16.mxu1 %v1161_v10  ;;  %v1176_v30 = vld [vmem:[#allocation5 + $0x8] sm:$0xff]   ;;  %v1180_v35 = vld [vmem:[#allocation5] sm:$0xff]   ;;  %v81_v37 = vld [vmem:[#allocation2] sm:$0xff] }
  0x3d   :  { %1014 = vmatpush3.bf16.msra.mxu0 %v1160_v9  ;;  %v1177_v31 = vld [vmem:[#allocation5 + $0xc8] sm:$0xff]   ;;  %v1181_v36 = vld [vmem:[#allocation5 + $0xc0] sm:$0xff]   ;;  %v92_v38 = vrot.slane %v81_v37, %v91_v34  ;;  %v85_v40 = vcombine.high %v81_v37, %v81_v37  ;;  %v1183_v41 = vld [vmem:[#allocation5 + $0x178] sm:$0xff]  }
  0x3e   :  { %1015 = vmatprep.subr.bf16.mxu0 %v1163_v12  ;;  %v1178_v32 = vld [vmem:[#allocation5 + $0x88] sm:$0xff]   ;;  %v1182_v39 = vld [vmem:[#allocation5 + $0x80] sm:$0xff]   ;;  %v1185_v48 = vld [vmem:[#allocation5 + $0x138] sm:$0xff]  }
  0x3f   :  { %1036 = vmatpush3.bf16.msra.mxu1 %v1162_v11  ;;  %v100_v42 = vcombine.high %v92_v38, %v92_v38  ;;  %v99_v43 = vrot.slane %v85_v40, %v91_v34  ;;  %v125_v44 = vpack.c.bf16 %v92_v38, %v92_v38  ;;  %v1186_v50 = vld [vmem:[#allocation5 + $0x170] sm:$0xff]   ;;  %v1188_v53 = vld [vmem:[#allocation5 + $0x168] sm:$0xff]   ;;  %v1190_v55 = vld [vmem:[#allocation5 + $0x160] sm:$0xff]  }
  0x40   :  { %1037 = vmatprep.subr.bf16.mxu1 %v1165_v14  ;;  %v1187_v52 = vld [vmem:[#allocation5 + $0x130] sm:$0xff]   ;;  %v1189_v54 = vld [vmem:[#allocation5 + $0x128] sm:$0xff]   ;;  %v1191_v56 = vld [vmem:[#allocation5 + $0x120] sm:$0xff]  }
  0x41   :  { %1016 = vmatpush3.bf16.msra.mxu0 %v1164_v13  ;;  %v126_v46 = vpack.c.bf16 %v100_v42, %v100_v42  ;;  %v101_v47 = vcombine.high %v99_v43, %v99_v43  ;;  %v127_v49 = vpack.c.bf16 %v99_v43, %v99_v43  ;;  %v1192_v57 = vld [vmem:[#allocation5 + $0x158] sm:$0xff]   ;;  %v1200_v58 = vld [vmem:[#allocation5 + $0x180] sm:$0xff]   ;;  %v1194_v63 = vld [vmem:[#allocation5 + $0x150] sm:$0xff]  }
  0x42   :  { %1017 = vmatprep.subr.bf16.mxu0 %v1167_v16  ;;  %v82_v59 = vld [vmem:[#allocation2 + $0x8] sm:$0x3f]  ;;  %v1195_v2 = vld [vmem:[#allocation5 + $0x110] sm:$0xff]   ;;  %v1196_v5 = vld [vmem:[#allocation5 + $0x148] sm:$0xff]  }
  0x43   :  { %1038 = vmatpush3.bf16.msra.mxu1 %v1166_v15  ;;  %567 = vmatprep.mubr.bf16.mxu0 %v126_v46  ;;  %v128_v51 = vpack.c.bf16 %v101_v47, %v101_v47  ;;  %v1193_v60 = vld [vmem:[#allocation5 + $0x118] sm:$0xff]   ;;  %v102_v61 = vcombine.high %v82_v59, %v82_v59  ;;  %v109_v62 = vrot.slane %v82_v59, %v91_v34  ;;  %v1197_v6 = vld [vmem:[#allocation5 + $0x108] sm:$0xff]   ;;  %v1198_v7 = vld [vmem:[#allocation5 + $0x140] sm:$0xff]  }
  0x44   :  { %1039 = vmatprep.subr.bf16.mxu1 %v1169_v18  ;;  %v1199_v8 = vld [vmem:[#allocation5 + $0x100] sm:$0xff]   ;;  %v1203_v11 = vld [vmem:[#allocation7 + $0x30] sm:$0xff]   ;;  %v1204_v12 = vld [vmem:[#allocation7 + $0x28] sm:$0xff]  }
  0x45   :  { %1018 = vmatpush3.bf16.msra.mxu0 %v1168_v17  ;;  %607 = vmatprep.mubr.bf16.mxu1 %v128_v51  ;;  %v116_v0 = vrot.slane %v102_v61, %v91_v34  ;;  %v117_v1 = vcombine.high %v109_v62, %v109_v62  ;;  %v129_v9 = vpack.c.bf16 %v109_v62, %v109_v62  ;;  %v1202_v10 = vld [vmem:[#allocation7 + $0x38] sm:$0xff]   ;;  %v1205_v13 = vld [vmem:[#allocation7 + $0x20] sm:$0xff]   ;;  %v1207_v15 = vld [vmem:[#allocation7 + $0x10] sm:$0xff]  }
  0x46   :  { %1019 = vmatprep.subr.bf16.mxu0 %v1171_v20  ;;  %v1206_v14 = vld [vmem:[#allocation7 + $0x18] sm:$0xff]   ;;  %v1208_v16 = vld [vmem:[#allocation7 + $0x8] sm:$0xff]   ;;  %v1209_v17 = vld [vmem:[#allocation7] sm:$0xff]  }
  0x47   :  { %1040 = vmatpush3.bf16.msra.mxu1 %v1170_v19  ;;  %v130_v3 = vpack.c.bf16 %v117_v1, %v117_v1  ;;  %v131_v4 = vpack.c.bf16 %v116_v0, %v116_v0  ;;  %v1210_v18 = vld [vmem:[#allocation8 + $0x38] sm:$0xff]   ;;  %v1211_v19 = vld [vmem:[#allocation8 + $0x30] sm:$0xff]   ;;  %v1212_v20 = vld [vmem:[#allocation8 + $0x28] sm:$0xff]  }
  0x48   :  { %1041 = vmatprep.subr.bf16.mxu1 %v1173_v25  ;;  %v1213_v21 = vld [vmem:[#allocation8 + $0x20] sm:$0xff]   ;;  %v1214_v22 = vld [vmem:[#allocation8 + $0x18] sm:$0xff]   ;;  %v1215_v23 = vld [vmem:[#allocation8 + $0x10] sm:$0xff]  }
  0x49   :  { %1020 = vmatpush3.bf16.msra.mxu0 %v1172_v24  ;;  %v940_v37 = vld [vmem:[%s1435_s2] ss:$0 sm:$0xff] }
  0x4a   :  { %1021 = vmatprep.subr.bf16.mxu0 %v1175_v27  ;;  %v1216_v51 = vld [vmem:[#allocation8 + $0x8] sm:$0xff]  }
  0x4b   :  { %1042 = vmatpush3.bf16.msra.mxu1 %v1174_v26  ;;  %v1000_v61 = vld [vmem:[%s1439_s6] ss:$0 sm:$0xff] }
  0x4c   :  { %1043 = vmatprep.subr.bf16.mxu1 %v1177_v31 }
  0x4d   :  { %1022 = vmatpush3.bf16.msra.mxu0 %v1176_v30 }
  0x4e   :  { %1023 = vmatprep.subr.bf16.mxu0 %v1179_v33 }
  0x4f   :  { %1044 = vmatpush3.bf16.msra.mxu1 %v1178_v32 }
  0x50   :  { %1045 = vmatprep.subr.bf16.mxu1 %v1181_v36 }
  0x51   :  { %1024 = vmatpush3.bf16.msra.mxu0 %v1180_v35 }
  0x52   :  { %1053 = vmatprep.subr.bf16.mxu0 %v1183_v41 }
  0x53   :  { %1046 = vmatpush3.bf16.msra.mxu1 %v1182_v39 }
  0x54   :  { %1095 = vmatprep.subr.bf16.mxu1 %v1333_v45  ;;  %568 = vmatmul.mubr.bf16.vlgmr.msra.gmra.mxu0 %v125_v44 }
  0x55   :  { %1054 = vmatpush3.bf16.msra.mxu0 %v1185_v48  ;;  %647 = vmatprep.mubr.bf16.mxu0 %v130_v3 }
  0x56   :  { %608 = vmatmul.mubr.bf16.vlgmr.msra.gmra.mxu1 %v127_v49  ;;  %1055 = vmatprep.subr.bf16.mxu0 %v1186_v50 }
  0x57   :  { %1097 = vmatprep.mubr.msk.bf16.mxu1 %vm1334_vm0, %v1333_v45  ;;  %1096 = vmatpush3.bf16.msra.mxu1 %v1200_v58 }
  0x58   :  { %1101 = vmatprep.subr.bf16.mxu1 %v1333_v45 }
  0x59   :  { %1056 = vmatpush3.bf16.msra.mxu0 %v1187_v52  ;;  %v1217_v52 = vld [vmem:[#allocation8] sm:$0xff]  }
  0x5a   :  { %1057 = vmatprep.subr.bf16.mxu0 %v1188_v53  ;;  %v991_v53 = vld [vmem:[%s1437_s4] ss:$0 sm:$0xff]  ;;  %s1298_s4 = scalar_lea.vmem %s930_s25, 16 }
  0x5b   :  { %p1299_p6 = scmp.ne.s32.totalorder %s930_s25, %s1298_s4  ;;  %p1304_p8 = scmp.lt.s32.totalorder %s1302_s26, %s1298_s4 }
  0x5d   :  { %1058 = vmatpush3.bf16.msra.mxu0 %v1189_v54  ;;  %p1305_p9 = por %p1304_p8, %p1303_p7 }
  0x5e   :  { %1059 = vmatprep.subr.bf16.mxu0 %v1190_v55  ;;  %1098 = vmatmul.mubr.msk.bf16.vlgmr.msra.gmra.mxu1 %vm531_vm1, %v131_v4 }
  0x5f   :  { %1117 = vmatprep.mubr.msk.bf16.mxu1 %vm1334_vm0, %v1333_v45  ;;  %1102 = vmatpush3.bf16.msra.mxu1 %v1202_v10  ;;  %p1306_p10 = pnand %p1305_p9, %p1299_p6 }
  0x60   :  { %1103 = vmatprep.subr.bf16.mxu1 %v1333_v45 }
  0x61   :  { %1060 = vmatpush3.bf16.msra.mxu0 %v1191_v56 }
  0x62   :  { %1061 = vmatprep.subr.bf16.mxu0 %v1192_v57 }
  0x63   :  { %1104 = vmatpush3.bf16.msra.mxu1 %v1203_v11 }
  0x64   :  { %1105 = vmatprep.subr.bf16.mxu1 %v1333_v45 }
  0x65   :  { %1062 = vmatpush3.bf16.msra.mxu0 %v1193_v60 }
  0x66   :  { %1063 = vmatprep.subr.bf16.mxu0 %v1194_v63 }
  0x67   :  { %1106 = vmatpush3.bf16.msra.mxu1 %v1204_v12 }
  0x68   :  { %1107 = vmatprep.subr.bf16.mxu1 %v1333_v45 }
  0x69   :  { %1064 = vmatpush3.bf16.msra.mxu0 %v1195_v2 }
  0x6a   :  { %1065 = vmatprep.subr.bf16.mxu0 %v1196_v5 }
  0x6b   :  { %1108 = vmatpush3.bf16.msra.mxu1 %v1205_v13 }
  0x6c   :  { %1109 = vmatprep.subr.bf16.mxu1 %v1333_v45 }
  0x6d   :  { %1066 = vmatpush3.bf16.msra.mxu0 %v1197_v6 }
  0x6e   :  { %1067 = vmatprep.subr.bf16.mxu0 %v1198_v7 }
  0x6f   :  { %1110 = vmatpush3.bf16.msra.mxu1 %v1206_v14 }
  0x70   :  { %1111 = vmatprep.subr.bf16.mxu1 %v1333_v45 }
  0x71   :  { %1068 = vmatpush3.bf16.msra.mxu0 %v1199_v8 }
  0x72   :  { %1121 = vmatprep.subr.bf16.mxu0 %v1333_v45 }
  0x73   :  { %1112 = vmatpush3.bf16.msra.mxu1 %v1207_v15 }
  0x74   :  { %648 = vmatmul.mubr.bf16.vlgmr.msra.gmra.mxu0 %v129_v9  ;;  %1113 = vmatprep.subr.bf16.mxu1 %v1333_v45 }
  0x75   :  { %1137 = vmatprep.mubr.msk.bf16.mxu0 %vm1334_vm0, %v1333_v45  ;;  %1122 = vmatpush3.bf16.msra.mxu0 %v1210_v18 }
  0x76   :  { %1123 = vmatprep.subr.bf16.mxu0 %v1333_v45 }
  0x77   :  { %1114 = vmatpush3.bf16.msra.mxu1 %v1208_v16 }
  0x78   :  { %1115 = vmatprep.subr.bf16.mxu1 %v1333_v45 }
  0x79   :  { %1124 = vmatpush3.bf16.msra.mxu0 %v1211_v19 }
  0x7a   :  { %1125 = vmatprep.subr.bf16.mxu0 %v1333_v45 }
  0x7b   :  { %1116 = vmatpush3.bf16.msra.mxu1 %v1209_v17 }
  0x7d   :  { %1126 = vmatpush3.bf16.msra.mxu0 %v1212_v20 }
  0x7e   :  { %1127 = vmatprep.subr.bf16.mxu0 %v1333_v45 }
  0x81   :  { %1128 = vmatpush3.bf16.msra.mxu0 %v1213_v21 }
  0x82   :  { %1129 = vmatprep.subr.bf16.mxu0 %v1333_v45 }
  0x85   :  { %1130 = vmatpush3.bf16.msra.mxu0 %v1214_v22 }
  0x86   :  { %1131 = vmatprep.subr.bf16.mxu0 %v1333_v45 }
  0x89   :  { %1132 = vmatpush3.bf16.msra.mxu0 %v1215_v23 }
  0x8a   :  { %1133 = vmatprep.subr.bf16.mxu0 %v1333_v45 }
  0x8d   :  { %1134 = vmatpush3.bf16.msra.mxu0 %v1216_v51 }
  0x8e   :  { %1135 = vmatprep.subr.bf16.mxu0 %v1333_v45 }
  0x91   :  { %1136 = vmatpush3.bf16.msra.mxu0 %v1217_v52 }
 0x114   :  { %v1025_v24 = vpop.f32.mrf.mxu0 }
 0x116   :  { %v1026_v25 = vpop.f32.mrf.mxu0  ;;  %v1047_v26 = vpop.f32.mrf.mxu1 }
 0x117   :  { %v1027_v36 = vadd.f32 %v1026_v25, %v1025_v24 }
 0x118   :  { %v1028_v27 = vpop.f32.mrf.mxu0  ;;  %v1048_v28 = vpop.f32.mrf.mxu1 }
 0x119   :  { %v570_v38 = vadd.f32 %v1027_v36, %v940_v37  ;;  %v1049_v39 = vadd.f32 %v1048_v28, %v1047_v26 }
 0x11a   :  { %v1029_v29 = vpop.f32.mrf.mxu0  ;;  %v1050_v30 = vpop.f32.mrf.mxu1 }
 0x11b   :  { %v610_v42 = vadd.f32 %v1049_v39, %v570_v38 }
 0x11c   :  { %v1051_v31 = vpop.f32.mrf.mxu1 }
 0x11e   :  { %v689_v32 = vpop.f32.mrf.mxu1 }
 0x120   :  { %v1099_v33 = vpop.f32.mrf.mxu1 }
 0x122   :  { %v692_v34 = vpop.f32.mrf.mxu1 }
 0x124   :  { %v1100_v35 = vpop.f32.mrf.mxu1 }
 0x134   :  { %v1069_v40 = vpop.f32.mrf.mxu0 }
 0x136   :  { %v1070_v41 = vpop.f32.mrf.mxu0 }
 0x137   :  { %v1071_v43 = vadd.f32 %v1070_v41, %v1069_v40 }
 0x138   :  { %v1072_v44 = vpop.f32.mrf.mxu0 }
 0x139   :  { %v650_v46 = vadd.f32 %v1071_v43, %v610_v42 }
 0x13a   :  { %v1073_v47 = vpop.f32.mrf.mxu0 }
 0x13b   :  { %v690_v48 = vadd.f32 %v689_v32, %v650_v46 }
 0x13d   :  { %v695_v49 = vmax.f32 %v690_v48, 0.0 }
 0x13f   :  { %v696_v50 = vpack.c.bf16 %v695_v49, %v695_v49 }
 0x141   :  { %1118 = vmatmul.mubr.bf16.vlgmr.msra.gmra.mxu1 %v696_v50 }
 0x201   :  { %v802_v54 = vpop.f32.mrf.mxu1 }
 0x202   :  { %v803_v55 = vadd.f32 %v991_v53, %v802_v54 }
 0x203   :  { %v1119_v56 = vpop.f32.mrf.mxu1 }
 0x204   :  { %v808_v57 = vmax.f32 %v803_v55, 0.0 }
 0x205   :  { %v805_v58 = vpop.f32.mrf.mxu1 }
 0x206   :  { %v809_v59 = vpack.c.bf16 %v808_v57, %v808_v57 }
 0x207   :  { %v1120_v60 = vpop.f32.mrf.mxu1 }
 0x208   :  { %1138 = vmatmul.mubr.bf16.vlgmr.msra.gmra.mxu0 %v809_v59 }
 0x2c8   :  { %v915_v62 = vpop.f32.mrf.mxu0 }
 0x2c9   :  { %v916_v45 = vadd.f32 %v1000_v61, %v915_v62 }
 0x2ca   :  { %v1139_v63 = vpop.f32.mrf.mxu0 }
 0x2cb   :  { %v921_v0 = vpack.c.bf16 %v916_v45, %v916_v45 }
 0x2cc   :  { %v918_v1 = vpop.f32.mrf.mxu0 }
 0x2cd   :  { %922 = vst [vmem:[#allocation10] sm:$0x1] %v921_v0 }
 0x2ce   :  { %v1140_v2 = vpop.f32.mrf.mxu0 }
 0x2cf   :  { %1309 = shalt.err (!%p1306_p10)
}
 0x2d0   :  { %932 = dma.vmem_to_hbm [thread:$0]  %s930_s25, 16, %s1440_s7, [#allocation4]  }
 0x2d1   :  { %1324 = dma.done.wait [#allocation4], 16  }
 0x2d2   :  { %1325 = vsyncadd [#allocation4], 4294967280 }
 0x2d3   :  { %936 = vsyncpa [#allocation3], 1 }
 0x2d4   :  { %937 = vsyncpa [#allocation6], 1 }
 0x2d5   :  { %938 = vsyncpa [#allocation9], 1 }
 0x2d6   :  { %939 = vsyncpa [#allocation4], 1 }

</bundles_post_ra>
